<compile_context>
chip_gen: v5e
topology: v5e:2x2
jax: 0.10.0
libtpu: 0.0.40
codegen_flags: <defaults>
</compile_context>

<pallas_src>
import functools

import jax
import jax.numpy as jnp
from jax.experimental import pallas as pl
from jax.experimental.pallas import tpu as pltpu


def _grpo_chunk_kernel(tgt_ref, reflp_ref, mask_ref, logits_ref,
                       pilp_ref, ksum_ref,
                       m_sc, l_sc, tgt_sc,
                       *, kl_coeff, seq_block, vocab_block, num_vocab_blocks,
                       vocab_size):
    """One (batch row, sequence tile, vocab tile) grid step.

    Block shapes:
      logits_ref : (1, tS, tV)  bf16/f32 in HBM, upcast to f32 per tile only
      tgt_ref    : (1, cS, 1)   int32, resident per batch row
      reflp_ref  : (1, cS, 1)   f32,   resident per batch row
      mask_ref   : (1, cS, 1)   f32,   resident per batch row
      pilp_ref   : (1, tS, 1)   f32 output (written/flushed once per (b, s))
      ksum_ref   : (1, 1, 1)    f32 accumulator (resident across s and v)
      m_sc/l_sc/tgt_sc : (1, tS, 1) f32 scratch: online-LSE state + target logit.
    """
    s = pl.program_id(1)
    v = pl.program_id(2)

    @pl.when((s == 0) & (v == 0))
    def _init_ksum():
        ksum_ref[...] = jnp.zeros(ksum_ref.shape, ksum_ref.dtype)

    @pl.when(v == 0)
    def _init_lse():
        m_sc[...] = jnp.full(m_sc.shape, -jnp.inf, m_sc.dtype)
        l_sc[...] = jnp.zeros(l_sc.shape, l_sc.dtype)
        tgt_sc[...] = jnp.zeros(tgt_sc.shape, tgt_sc.dtype)

    s_start = pl.multiple_of(s * seq_block, seq_block)

    # ---- single streaming pass over this vocab tile -------------------------
    col_ids = jax.lax.broadcasted_iota(jnp.int32, logits_ref.shape, 2)
    logits = logits_ref[...].astype(jnp.float32)          # f32 lives only per-tile

    if vocab_size % vocab_block != 0:
        # Trailing vocab tile is partially out of bounds: the padded columns
        # hold unspecified data, force them to -inf so they contribute 0.
        logits = jnp.where(col_ids < vocab_size - v * vocab_block,
                           logits, -jnp.inf)

    # Online log-sum-exp update (max + exp-sum fused, one sweep).
    m_prev = m_sc[...]
    m_new = jnp.maximum(m_prev, jnp.max(logits, axis=-1, keepdims=True))
    l_sc[...] = (l_sc[...] * jnp.exp(m_prev - m_new)
                 + jnp.sum(jnp.exp(logits - m_new), axis=-1, keepdims=True))
    m_sc[...] = m_new

    # Target-logit gather fused into the same sweep: compare against the
    # *local* target id so there is no per-element index offset add.
    tgt_local = tgt_ref[:, pl.ds(s_start, seq_block), :] - v * vocab_block
    tgt_sc[...] += jnp.sum(jnp.where(col_ids == tgt_local, logits, 0.0),
                           axis=-1, keepdims=True)

    @pl.when(v == num_vocab_blocks - 1)
    def _finish():
        # pi_logprobs = target_logit - logsumexp  (== -cross_entropy)
        pi_lp = tgt_sc[...] - (m_sc[...] + jnp.log(l_sc[...]))    # (1, tS, 1)
        pilp_ref[...] = pi_lp

        # Fused masked per-row KL accumulation.  Mask BEFORE the exp so padded
        # positions contribute exactly 0 and can never overflow to inf.
        mask = mask_ref[:, pl.ds(s_start, seq_block), :]
        valid = mask > 0.5
        diff = jnp.where(valid,
                         reflp_ref[:, pl.ds(s_start, seq_block), :] - pi_lp,
                         0.0)
        per_token_kl = jnp.exp(diff) - diff - 1.0                  # 0 when masked
        ksum_ref[...] += jnp.sum(per_token_kl, axis=(0, 1, 2), keepdims=True)


def _vmem_capacity_bytes():
    """Physical VMEM of the local TPU; conservative 64 MiB if unknown."""
    try:
        return int(pltpu.get_tpu_info().vmem_capacity_bytes)
    except Exception:
        return 64 * 1024 * 1024


def _choose_tiles(chunk_len, vocab, itemsize):
    """Pick (seq_tile, vocab_tile, vmem_limit) for one (B, cS, V) logits chunk."""
    cap = _vmem_capacity_bytes()
    if cap <= 64 * 1024 * 1024:             # v7x: 64 MiB physical VMEM
        vmem_limit = 48 * 1024 * 1024
        store_budget = 3 * 1024 * 1024      # stored-dtype logits tile
    else:                                    # v5e / v6e: 128 MiB physical VMEM
        vmem_limit = 96 * 1024 * 1024
        store_budget = 8 * 1024 * 1024
    f32_budget = 4 * 1024 * 1024            # bound on per-step f32 temporaries

    # Sequence tile: largest packing-friendly divisor of the chunk length
    # (16-row multiples for 2-byte dtypes so bf16 sublane packing is full-width).
    row_mult = {1: 32, 2: 16}.get(itemsize, 8)
    max_rows = 512
    if chunk_len % row_mult == 0:
        ts = min(chunk_len, max_rows)
        ts -= ts % row_mult
        while chunk_len % ts:
            ts -= row_mult
    elif chunk_len % 8 == 0:
        ts = min(chunk_len, max_rows)
        ts -= ts % 8
        while chunk_len % ts:
            ts -= 8
    else:
        # Ragged chunk: use the whole extent (a valid full-dim block); the
        # vocab tiling below still bounds VMEM, so no OOM hazard.
        ts = chunk_len

    # Vocab tile: bounded by both the stored-tile and the f32-temp budgets.
    max_cols = min(store_budget // max(1, ts * itemsize),
                   f32_budget // max(1, ts * 4))
    max_cols = max(128, max_cols)
    tv = vocab if max_cols >= vocab else (max_cols // 128) * 128
    return ts, tv, vmem_limit


def _grpo_chunk_call(logits_chunk, tgt_chunk, ref_chunk, mask_chunk,
                     *, kl_coeff, seq_block=None, vocab_block=None):
    """Run the fused GRPO kernel on one sequence chunk.

    Returns (pi_logprobs [B, cS], kl_sum [B]).
    """
    B, cS, V = logits_chunk.shape
    tS, tV, vmem_limit = _choose_tiles(cS, V, logits_chunk.dtype.itemsize)
    if (seq_block is not None and cS % seq_block == 0
            and (seq_block % 8 == 0 or seq_block == cS)):
        tS = seq_block
    if vocab_block is not None and (vocab_block % 128 == 0 or vocab_block >= V):
        tV = min(vocab_block, V)
    n_s = cS // tS
    n_v = pl.cdiv(V, tV)

    tgt3 = tgt_chunk.astype(jnp.int32).reshape(B, cS, 1)
    ref3 = ref_chunk.astype(jnp.float32).reshape(B, cS, 1)
    msk3 = mask_chunk.astype(jnp.float32).reshape(B, cS, 1)

    # Side inputs are resident per batch row (one DMA per row, sliced in-kernel).
    row_spec = pl.BlockSpec((1, cS, 1), lambda b, s, v: (b, 0, 0))
    logits_spec = pl.BlockSpec((1, tS, tV), lambda b, s, v: (b, s, v))
    pilp_spec = pl.BlockSpec((1, tS, 1), lambda b, s, v: (b, s, 0))
    ksum_spec = pl.BlockSpec((1, 1, 1), lambda b, s, v: (b, 0, 0))

    kernel = functools.partial(
        _grpo_chunk_kernel, kl_coeff=kl_coeff, seq_block=tS, vocab_block=tV,
        num_vocab_blocks=n_v, vocab_size=V)

    pilp3, ksum = pl.pallas_call(
        kernel,
        out_shape=(jax.ShapeDtypeStruct((B, cS, 1), jnp.float32),   # pi_logprobs
                   jax.ShapeDtypeStruct((B, 1, 1), jnp.float32)),   # sum(kl*mask)
        grid_spec=pltpu.PrefetchScalarGridSpec(
            num_scalar_prefetch=0,
            grid=(B, n_s, n_v),
            in_specs=[row_spec, row_spec, row_spec, logits_spec],
            out_specs=[pilp_spec, ksum_spec],
            scratch_shapes=[pltpu.VMEM((1, tS, 1), jnp.float32),    # running max
                            pltpu.VMEM((1, tS, 1), jnp.float32),    # running sumexp
                            pltpu.VMEM((1, tS, 1), jnp.float32)]),  # target logit
        compiler_params=pltpu.CompilerParams(
            dimension_semantics=("parallel", "arbitrary", "arbitrary"),
            vmem_limit_bytes=vmem_limit),
    )(tgt3, ref3, msk3, logits_chunk)

    return pilp3[..., 0], ksum[:, 0, 0]


def grpo_forward(pi_logits, targets, ref_logprobs, advantages,
                 padding_masks=None, kl_coeff=0.1,
                 seq_block=None, vocab_block=None):
    """Forward pass of GRPOWithChunkedOutputLoss.

    `pi_logits` may be a full [B, S, V] array or a list of sequence chunks
    (as produced by a chunked LM head).  Chunks are fed to the kernel one at
    a time -- never concatenated -- so the logits are read from HBM exactly
    once.  Returns (loss, policy_loss, kl_loss, ratios, clipfrac, pi_logprobs).
    """
    # TODO(synk): if chunks are equal length, a leading grid axis (or a scan
    #             over stacked chunks) would avoid per-chunk launch overhead.
    if not isinstance(pi_logits, (list, tuple)):
        pi_logits = [pi_logits]
    num_chunks = len(pi_logits)
    B = pi_logits[0].shape[0]

    if padding_masks is None:
        padding_masks = jnp.ones_like(targets, dtype=bool)
    mask_f = padding_masks.astype(jnp.float32)
    adv = advantages.astype(jnp.float32).reshape(B)

    offsets, off = [0], 0
    for c in pi_logits:
        off += c.shape[1]
        offsets.append(off)

    total_kl_sum = jnp.zeros((B,), jnp.float32)
    pilp_chunks = []
    for i in range(num_chunks):
        lo, hi = offsets[i], offsets[i + 1]
        pilp, ksum = _grpo_chunk_call(
            pi_logits[i],
            targets[:, lo:hi],
            ref_logprobs[:, lo:hi],
            mask_f[:, lo:hi],
            kl_coeff=kl_coeff,
            seq_block=seq_block,
            vocab_block=vocab_block,
        )
        total_kl_sum = total_kl_sum + ksum
        pilp_chunks.append(pilp)

    pi_logprobs = (pilp_chunks[0] if num_chunks == 1
                   else jnp.concatenate(pilp_chunks, axis=1))

    # Cheap O(B*S) epilogue in plain JAX (forward pass: exp(lp - detach(lp)) == 1,
    # so the masked policy sum is just advantage * token_count).
    total_token_count = mask_f.sum(axis=1)
    total_policy_sum = adv * total_token_count
    total_loss_sum = -(total_policy_sum - kl_coeff * total_kl_sum)

    total_token_count = jnp.clip(total_token_count, 1e-9, None)
    loss = jnp.mean(total_loss_sum / total_token_count)
    policy_loss = jnp.mean(total_policy_sum / total_token_count)
    kl_loss = jnp.mean(total_kl_sum / total_token_count)
    ratios = jnp.float32(1.0)
    clipfrac = jnp.float32(0.0)
    return loss, policy_loss, kl_loss, ratios, clipfrac, pi_logprobs


def _reference_forward(pi_logits_full, targets, ref_logprobs, advantages,
                       padding_masks, kl_coeff):
    """Pure-JAX reference mirroring the PyTorch module (forward values)."""
    logits = pi_logits_full.astype(jnp.float32)
    logp = jax.nn.log_softmax(logits, axis=-1)
    pi_lp = jnp.take_along_axis(
        logp, targets[..., None].astype(jnp.int32), axis=-1)[..., 0]
    diff = ref_logprobs.astype(jnp.float32) - pi_lp
    kl = jnp.exp(diff) - diff - 1.0
    pol = jnp.ones_like(pi_lp) * advantages[:, None]
    per_tok = -(pol - kl_coeff * kl)
    mask = padding_masks.astype(jnp.float32)
    cnt = jnp.clip(mask.sum(1), 1e-9, None)
    return (jnp.mean((per_tok * mask).sum(1) / cnt),
            jnp.mean((pol * mask).sum(1) / cnt),
            jnp.mean((kl * mask).sum(1) / cnt),
            pi_lp)


if __name__ == "__main__":
    B, S, V = 2, 64, 512
    num_output_chunks = 2
    kl_coeff = 0.1

    key = jax.random.PRNGKey(0)
    k1, k2, k3, k4, k5 = jax.random.split(key, 5)

    # bf16 logits in HBM (kernel upcasts per vocab tile): halves the dominant read.
    pi_logits_full = jax.random.normal(
        k1, (B, S, V), dtype=jnp.float32).astype(jnp.bfloat16)
    targets = jax.random.randint(k2, (B, S), 0, V, dtype=jnp.int32)
    ref_logprobs = -jnp.abs(jax.random.normal(k3, (B, S), dtype=jnp.float32)) - 1.0
    advantages = jax.random.normal(k4, (B,), dtype=jnp.float32)
    padding_masks = jax.random.bernoulli(k5, 0.8, (B, S))

    # Chunked-output form, as the module would receive from a chunked LM head.
    chunk = S // num_output_chunks
    pi_logits_chunks = [pi_logits_full[:, i * chunk:(i + 1) * chunk, :]
                        for i in range(num_output_chunks)]

    ref_loss, ref_pol, ref_kl, ref_pi_lp = _reference_forward(
        pi_logits_full, targets, ref_logprobs, advantages,
        padding_masks, kl_coeff)

    # Exercise: (a) auto tiling (whole vocab per step), (b) forced sequence +
    # vocab tiling (online LSE across vocab grid steps), (c) a vocab tile that
    # does NOT divide V (masked, partially out-of-bounds trailing tile).
    configs = [dict(),
               dict(seq_block=16, vocab_block=128),
               dict(seq_block=16, vocab_block=384)]
    for cfg in configs:
        outs = grpo_forward(pi_logits_chunks, targets, ref_logprobs, advantages,
                            padding_masks=padding_masks, kl_coeff=kl_coeff, **cfg)
        outs = jax.block_until_ready(outs)
        loss, policy_loss, kl_loss, ratios, clipfrac, pi_logprobs = outs

        assert jnp.allclose(pi_logprobs, ref_pi_lp, rtol=1e-4, atol=1e-4), \
            f"pi_logprobs mismatch for cfg={cfg}"
        assert jnp.allclose(loss, ref_loss, rtol=1e-4, atol=1e-4), \
            f"loss mismatch for cfg={cfg}"
        assert jnp.allclose(policy_loss, ref_pol, rtol=1e-4, atol=1e-4), \
            f"policy_loss mismatch for cfg={cfg}"
        assert jnp.allclose(kl_loss, ref_kl, rtol=1e-4, atol=1e-4), \
            f"kl_loss mismatch for cfg={cfg}"
        assert float(ratios) == 1.0 and float(clipfrac) == 0.0

    print("KERNEL_OK")
</pallas_src>

<mosaic_0001>
module attributes {stable_mosaic.version = 11 : i64} {
  func.func @_grpo_chunk_kernel(%arg0: i32, %arg1: i32, %arg2: i32, %arg3: memref<1x32x1xi32, #tpu.memory_space<vmem>>, %arg4: memref<1x32x1xf32, #tpu.memory_space<vmem>>, %arg5: memref<1x32x1xf32, #tpu.memory_space<vmem>>, %arg6: memref<1x32x512xbf16, #tpu.memory_space<vmem>>, %arg7: memref<1x32x1xf32, #tpu.memory_space<vmem>>, %arg8: memref<1x1x1xf32, #tpu.memory_space<vmem>>, %arg9: memref<1x32x1xf32, #tpu.memory_space<vmem>>, %arg10: memref<1x32x1xf32, #tpu.memory_space<vmem>>, %arg11: memref<1x32x1xf32, #tpu.memory_space<vmem>>) attributes {dimension_semantics = [#tpu.dimension_semantics<parallel>, #tpu.dimension_semantics<arbitrary>, #tpu.dimension_semantics<arbitrary>], iteration_bounds = array<i64: 2, 1, 1>, scalar_prefetch = 0 : i64, scratch_operands = 3 : i64, tpu.core_type = #tpu.core_type<tc>, window_params = [{transform_indices = @transform_0, window_bounds = array<i64: 1, 32, 1>}, {transform_indices = @transform_1, window_bounds = array<i64: 1, 32, 1>}, {transform_indices = @transform_2, window_bounds = array<i64: 1, 32, 1>}, {transform_indices = @transform_3, window_bounds = array<i64: 1, 32, 512>}, {transform_indices = @transform_4, window_bounds = array<i64: 1, 32, 1>}, {transform_indices = @transform_5, window_bounds = array<i64: 1, 1, 1>}]} {
    %c0_i32 = arith.constant 0 : i32
    %0 = arith.cmpi eq, %arg1, %c0_i32 : i32
    %c0_i32_0 = arith.constant 0 : i32
    %1 = arith.cmpi eq, %arg2, %c0_i32_0 : i32
    %2 = arith.andi %0, %1 : i1
    %3 = arith.extui %2 : i1 to i32
    %c0_i32_1 = arith.constant 0 : i32
    %4 = arith.cmpi ne, %3, %c0_i32_1 : i32
    scf.if %4 {
      %cst_31 = arith.constant 0.000000e+00 : f32
      %46 = vector.broadcast %cst_31 : f32 to vector<1x1x1xf32>
      %c0_32 = arith.constant 0 : index
      %c0_33 = arith.constant 0 : index
      %c0_34 = arith.constant 0 : index
      %47 = vector.load %arg8[%c0_32, %c0_33, %c0_34] : memref<1x1x1xf32, #tpu.memory_space<vmem>>, vector<1x1x1xf32>
      tpu.vector_store %arg8[%c0_32, %c0_33, %c0_34], %46 {strides = array<i32>} : memref<1x1x1xf32, #tpu.memory_space<vmem>>, vector<1x1x1xf32>,
    } else {
    }
    %c0_i32_2 = arith.constant 0 : i32
    %5 = arith.cmpi eq, %arg2, %c0_i32_2 : i32
    %6 = arith.extui %5 : i1 to i32
    %c0_i32_3 = arith.constant 0 : i32
    %7 = arith.cmpi ne, %6, %c0_i32_3 : i32
    scf.if %7 {
      %cst_31 = arith.constant 0xFF800000 : f32
      %46 = vector.broadcast %cst_31 : f32 to vector<1x32x1xf32>
      %c0_32 = arith.constant 0 : index
      %c0_33 = arith.constant 0 : index
      %c0_34 = arith.constant 0 : index
      %47 = vector.load %arg9[%c0_32, %c0_33, %c0_34] : memref<1x32x1xf32, #tpu.memory_space<vmem>>, vector<1x32x1xf32>
      tpu.vector_store %arg9[%c0_32, %c0_33, %c0_34], %46 {strides = array<i32>} : memref<1x32x1xf32, #tpu.memory_space<vmem>>, vector<1x32x1xf32>,
      %cst_35 = arith.constant 0.000000e+00 : f32
      %48 = vector.broadcast %cst_35 : f32 to vector<1x32x1xf32>
      %c0_36 = arith.constant 0 : index
      %c0_37 = arith.constant 0 : index
      %c0_38 = arith.constant 0 : index
      %49 = vector.load %arg10[%c0_36, %c0_37, %c0_38] : memref<1x32x1xf32, #tpu.memory_space<vmem>>, vector<1x32x1xf32>
      tpu.vector_store %arg10[%c0_36, %c0_37, %c0_38], %48 {strides = array<i32>} : memref<1x32x1xf32, #tpu.memory_space<vmem>>, vector<1x32x1xf32>,
      %cst_39 = arith.constant 0.000000e+00 : f32
      %50 = vector.broadcast %cst_39 : f32 to vector<1x32x1xf32>
      %c0_40 = arith.constant 0 : index
      %c0_41 = arith.constant 0 : index
      %c0_42 = arith.constant 0 : index
      %51 = vector.load %arg11[%c0_40, %c0_41, %c0_42] : memref<1x32x1xf32, #tpu.memory_space<vmem>>, vector<1x32x1xf32>
      tpu.vector_store %arg11[%c0_40, %c0_41, %c0_42], %50 {strides = array<i32>} : memref<1x32x1xf32, #tpu.memory_space<vmem>>, vector<1x32x1xf32>,
    } else {
    }
    %c32_i32 = arith.constant 32 : i32
    %8 = arith.muli %arg1, %c32_i32 : i32
    %9 = tpu.assume_multiple %8, 32 : i32
    %10 = tpu.iota {dimensions = array<i32: 2>} : vector<1x32x512xi32>
    %c0 = arith.constant 0 : index
    %c0_4 = arith.constant 0 : index
    %c0_5 = arith.constant 0 : index
    %11 = vector.load %arg6[%c0, %c0_4, %c0_5] : memref<1x32x512xbf16, #tpu.memory_space<vmem>>, vector<1x32x512xbf16>
    %12 = arith.extf %11 : vector<1x32x512xbf16> to vector<1x32x512xf32>
    %c0_6 = arith.constant 0 : index
    %c0_7 = arith.constant 0 : index
    %c0_8 = arith.constant 0 : index
    %13 = vector.load %arg9[%c0_6, %c0_7, %c0_8] : memref<1x32x1xf32, #tpu.memory_space<vmem>>, vector<1x32x1xf32>
    %cst = arith.constant dense<0xFF800000> : vector<1x32xf32>
    %14 = vector.multi_reduction <maximumf>, %12, %cst [2] : vector<1x32x512xf32> to vector<1x32xf32>
    %15 = vector.shape_cast %14 : vector<1x32xf32> to vector<1x32x1xf32>
    %16 = arith.maximumf %13, %15 : vector<1x32x1xf32>
    %c0_9 = arith.constant 0 : index
    %c0_10 = arith.constant 0 : index
    %c0_11 = arith.constant 0 : index
    %17 = vector.load %arg10[%c0_9, %c0_10, %c0_11] : memref<1x32x1xf32, #tpu.memory_space<vmem>>, vector<1x32x1xf32>
    %18 = arith.subf %13, %16 : vector<1x32x1xf32>
    %19 = math.exp %18 : vector<1x32x1xf32>
    %20 = arith.mulf %17, %19 : vector<1x32x1xf32>
    %21 = vector.broadcast %16 : vector<1x32x1xf32> to vector<1x32x512xf32>
    %22 = arith.subf %12, %21 : vector<1x32x512xf32>
    %23 = math.exp %22 : vector<1x32x512xf32>
    %cst_12 = arith.constant dense<0.000000e+00> : vector<1x32xf32>
    %24 = vector.multi_reduction <add>, %23, %cst_12 [2] : vector<1x32x512xf32> to vector<1x32xf32>
    %25 = vector.shape_cast %24 : vector<1x32xf32> to vector<1x32x1xf32>
    %26 = arith.addf %20, %25 : vector<1x32x1xf32>
    %c0_13 = arith.constant 0 : index
    %c0_14 = arith.constant 0 : index
    %c0_15 = arith.constant 0 : index
    %27 = vector.load %arg10[%c0_13, %c0_14, %c0_15] : memref<1x32x1xf32, #tpu.memory_space<vmem>>, vector<1x32x1xf32>
    tpu.vector_store %arg10[%c0_13, %c0_14, %c0_15], %26 {strides = array<i32>} : memref<1x32x1xf32, #tpu.memory_space<vmem>>, vector<1x32x1xf32>,
    %c0_16 = arith.constant 0 : index
    %c0_17 = arith.constant 0 : index
    %c0_18 = arith.constant 0 : index
    %28 = vector.load %arg9[%c0_16, %c0_17, %c0_18] : memref<1x32x1xf32, #tpu.memory_space<vmem>>, vector<1x32x1xf32>
    tpu.vector_store %arg9[%c0_16, %c0_17, %c0_18], %16 {strides = array<i32>} : memref<1x32x1xf32, #tpu.memory_space<vmem>>, vector<1x32x1xf32>,
    %c0_19 = arith.constant 0 : index
    %29 = arith.index_cast %9 : i32 to index
    %c0_20 = arith.constant 0 : index
    %30 = vector.load %arg3[%c0_19, %29, %c0_20] : memref<1x32x1xi32, #tpu.memory_space<vmem>>, vector<1x32x1xi32>
    %c512_i32 = arith.constant 512 : i32
    %31 = arith.muli %arg2, %c512_i32 : i32
    %32 = vector.broadcast %31 : i32 to vector<1x32x1xi32>
    %33 = arith.subi %30, %32 : vector<1x32x1xi32>
    %c0_21 = arith.constant 0 : index
    %c0_22 = arith.constant 0 : index
    %c0_23 = arith.constant 0 : index
    %34 = vector.load %arg11[%c0_21, %c0_22, %c0_23] : memref<1x32x1xf32, #tpu.memory_space<vmem>>, vector<1x32x1xf32>
    %35 = vector.broadcast %33 : vector<1x32x1xi32> to vector<1x32x512xi32>
    %36 = arith.cmpi eq, %10, %35 : vector<1x32x512xi32>
    %cst_24 = arith.constant 0.000000e+00 : f32
    %37 = vector.broadcast %cst_24 : f32 to vector<1x32x512xf32>
    %38 = arith.select %36, %12, %37 : vector<1x32x512xi1>, vector<1x32x512xf32>
    %cst_25 = arith.constant dense<0.000000e+00> : vector<1x32xf32>
    %39 = vector.multi_reduction <add>, %38, %cst_25 [2] : vector<1x32x512xf32> to vector<1x32xf32>
    %40 = vector.shape_cast %39 : vector<1x32xf32> to vector<1x32x1xf32>
    %41 = arith.addf %34, %40 : vector<1x32x1xf32>
    %c0_26 = arith.constant 0 : index
    %c0_27 = arith.constant 0 : index
    %c0_28 = arith.constant 0 : index
    %42 = vector.load %arg11[%c0_26, %c0_27, %c0_28] : memref<1x32x1xf32, #tpu.memory_space<vmem>>, vector<1x32x1xf32>
    tpu.vector_store %arg11[%c0_26, %c0_27, %c0_28], %41 {strides = array<i32>} : memref<1x32x1xf32, #tpu.memory_space<vmem>>, vector<1x32x1xf32>,
    %c0_i32_29 = arith.constant 0 : i32
    %43 = arith.cmpi eq, %arg2, %c0_i32_29 : i32
    %44 = arith.extui %43 : i1 to i32
    %c0_i32_30 = arith.constant 0 : i32
    %45 = arith.cmpi ne, %44, %c0_i32_30 : i32
    scf.if %45 {
      %c0_31 = arith.constant 0 : index
      %c0_32 = arith.constant 0 : index
      %c0_33 = arith.constant 0 : index
      %46 = vector.load %arg11[%c0_31, %c0_32, %c0_33] : memref<1x32x1xf32, #tpu.memory_space<vmem>>, vector<1x32x1xf32>
      %c0_34 = arith.constant 0 : index
      %c0_35 = arith.constant 0 : index
      %c0_36 = arith.constant 0 : index
      %47 = vector.load %arg9[%c0_34, %c0_35, %c0_36] : memref<1x32x1xf32, #tpu.memory_space<vmem>>, vector<1x32x1xf32>
      %c0_37 = arith.constant 0 : index
      %c0_38 = arith.constant 0 : index
      %c0_39 = arith.constant 0 : index
      %48 = vector.load %arg10[%c0_37, %c0_38, %c0_39] : memref<1x32x1xf32, #tpu.memory_space<vmem>>, vector<1x32x1xf32>
      %49 = math.log %48 : vector<1x32x1xf32>
      %50 = arith.addf %47, %49 : vector<1x32x1xf32>
      %51 = arith.subf %46, %50 : vector<1x32x1xf32>
      %c0_40 = arith.constant 0 : index
      %c0_41 = arith.constant 0 : index
      %c0_42 = arith.constant 0 : index
      %52 = vector.load %arg7[%c0_40, %c0_41, %c0_42] : memref<1x32x1xf32, #tpu.memory_space<vmem>>, vector<1x32x1xf32>
      tpu.vector_store %arg7[%c0_40, %c0_41, %c0_42], %51 {strides = array<i32>} : memref<1x32x1xf32, #tpu.memory_space<vmem>>, vector<1x32x1xf32>,
      %c0_43 = arith.constant 0 : index
      %53 = arith.index_cast %9 : i32 to index
      %c0_44 = arith.constant 0 : index
      %54 = vector.load %arg5[%c0_43, %53, %c0_44] : memref<1x32x1xf32, #tpu.memory_space<vmem>>, vector<1x32x1xf32>
      %cst_45 = arith.constant 5.000000e-01 : f32
      %55 = vector.broadcast %cst_45 : f32 to vector<1x32x1xf32>
      %56 = arith.cmpf ogt, %54, %55 : vector<1x32x1xf32>
      %c0_46 = arith.constant 0 : index
      %57 = arith.index_cast %9 : i32 to index
      %c0_47 = arith.constant 0 : index
      %58 = vector.load %arg4[%c0_46, %57, %c0_47] : memref<1x32x1xf32, #tpu.memory_space<vmem>>, vector<1x32x1xf32>
      %59 = arith.subf %58, %51 : vector<1x32x1xf32>
      %cst_48 = arith.constant 0.000000e+00 : f32
      %60 = vector.broadcast %cst_48 : f32 to vector<1x32x1xf32>
      %61 = arith.select %56, %59, %60 : vector<1x32x1xi1>, vector<1x32x1xf32>
      %62 = math.exp %61 : vector<1x32x1xf32>
      %63 = arith.subf %62, %61 : vector<1x32x1xf32>
      %cst_49 = arith.constant 1.000000e+00 : f32
      %64 = vector.broadcast %cst_49 : f32 to vector<1x32x1xf32>
      %65 = arith.subf %63, %64 : vector<1x32x1xf32>
      %c0_50 = arith.constant 0 : index
      %c0_51 = arith.constant 0 : index
      %c0_52 = arith.constant 0 : index
      %66 = vector.load %arg8[%c0_50, %c0_51, %c0_52] : memref<1x1x1xf32, #tpu.memory_space<vmem>>, vector<1x1x1xf32>
      %67 = vector.shape_cast %65 : vector<1x32x1xf32> to vector<1x1x32x1xf32>
      %cst_53 = arith.constant dense<0.000000e+00> : vector<1xf32>
      %68 = vector.multi_reduction <add>, %67, %cst_53 [1, 2, 3] : vector<1x1x32x1xf32> to vector<1xf32>
      %69 = vector.shape_cast %68 : vector<1xf32> to vector<1x1x1x1xf32>
      %70 = vector.extract %69[0, 0, 0, 0] : f32 from vector<1x1x1x1xf32>
      %71 = vector.broadcast %70 : f32 to vector<1x1x1xf32>
      %72 = arith.addf %66, %71 : vector<1x1x1xf32>
      %c0_54 = arith.constant 0 : index
      %c0_55 = arith.constant 0 : index
      %c0_56 = arith.constant 0 : index
      %73 = vector.load %arg8[%c0_54, %c0_55, %c0_56] : memref<1x1x1xf32, #tpu.memory_space<vmem>>, vector<1x1x1xf32>
      tpu.vector_store %arg8[%c0_54, %c0_55, %c0_56], %72 {strides = array<i32>} : memref<1x1x1xf32, #tpu.memory_space<vmem>>, vector<1x1x1xf32>,
    } else {
    }
    return
  }
  func.func @transform_0(%arg0: i32, %arg1: i32, %arg2: i32) -> (i32, i32, i32) {
    %c0_i32 = arith.constant 0 : i32
    %c0_i32_0 = arith.constant 0 : i32
    %c0_i32_1 = arith.constant 0 : i32
    return %arg0, %c0_i32, %c0_i32_0 : i32, i32, i32
  }
  func.func @transform_1(%arg0: i32, %arg1: i32, %arg2: i32) -> (i32, i32, i32) {
    %c0_i32 = arith.constant 0 : i32
    %c0_i32_0 = arith.constant 0 : i32
    %c0_i32_1 = arith.constant 0 : i32
    return %arg0, %c0_i32, %c0_i32_0 : i32, i32, i32
  }
  func.func @transform_2(%arg0: i32, %arg1: i32, %arg2: i32) -> (i32, i32, i32) {
    %c0_i32 = arith.constant 0 : i32
    %c0_i32_0 = arith.constant 0 : i32
    %c0_i32_1 = arith.constant 0 : i32
    return %arg0, %c0_i32, %c0_i32_0 : i32, i32, i32
  }
  func.func @transform_3(%arg0: i32, %arg1: i32, %arg2: i32) -> (i32, i32, i32) {
    %c0_i32 = arith.constant 0 : i32
    return %arg0, %arg1, %arg2 : i32, i32, i32
  }
  func.func @transform_4(%arg0: i32, %arg1: i32, %arg2: i32) -> (i32, i32, i32) {
    %c0_i32 = arith.constant 0 : i32
    %c0_i32_0 = arith.constant 0 : i32
    return %arg0, %arg1, %c0_i32 : i32, i32, i32
  }
  func.func @transform_5(%arg0: i32, %arg1: i32, %arg2: i32) -> (i32, i32, i32) {
    %c0_i32 = arith.constant 0 : i32
    %c0_i32_0 = arith.constant 0 : i32
    %c0_i32_1 = arith.constant 0 : i32
    return %arg0, %c0_i32, %c0_i32_0 : i32, i32, i32
  }
}

</mosaic_0001>

<bundles_post_ra>
// kernel: tpu_custom_call.1
= control target key start
LH: loop header
LB: loop body
LE: loop exit
PB: predicated region body
PF: predicated region fallthrough
CT: control target
= control target key end

     0   :  { %s1077_s18 = smov 0   ;;  %s1079_s19 = smov 0   ;;  %s1353_s0 = inlined_call_operand.vmem [shape: s32[2,32,1], index: 0, kind: input, shape index: {}]   ;;  %s1354_s1 = inlined_call_operand.vmem [shape: f32[2,32,1], index: 1, kind: input, shape index: {}]   ;;  %s1355_s2 = inlined_call_operand.vmem [shape: f32[2,32,1], index: 2, kind: input, shape index: {}]   ;;  %s1356_s3 = inlined_call_operand.vmem [shape: bf16[2,32,512], index: 3, kind: input, shape index: {}]   ;;  %s1357_s4 = inlined_call_operand.vmem [shape: f32[2,32,1], index: 4, kind: output, shape index: {0}]   ;;  %s1358_s5 = inlined_call_operand.vmem [shape: f32[2,1,1], index: 5, kind: output, shape index: {1}]  }
   0x1   :  { %s1081_s20 = smov 0  }
   0x2 LB: > { %s35_s21 = sadd.s32 1, %s1038_s19  ;;  %p910_p0 = scmp.ge.s32.totalorder %s1042_s20, 1  ;;  %s1042_s20 = sphi %s1081_s20, %s16_s20   ;;  %s1038_s19 = sphi %s1079_s19, %s1360_s19   ;;  %s1034_s18 = sphi %s1077_s18, %s1359_s18  }
   0x3   : > { %p37_p1 = scmp.ge.s32.totalorder %s35_s21, 2  ;;  %p256_p2 = scmp.lt.s32.totalorder %s1042_s20, 3 }
   0x5   : > { %s1362_s21 = smov (%p37_p1, %s35_s21), 0  ;;  %p257_p3 = pnand %p910_p0, %p256_p2 }
   0x6   : > { %p315_p4 = scmp.lt.s32.totalorder (!%p257_p3), %s1034_s18, 1 }
   0x7   : > { %260 = sbr.rel (%p257_p3) target bundleno = 624 (0x270), region = 36 }
   0xc   : > { %vm370_vm0 = vcmask 7168   ;;  %v1044_v0 = vmov -inf   ;;  %s1364_s18 = smov (!%p315_p4, %s1034_s18), 1  ;;  %v1045_v37 = vmov 0   ;;  %v1046_v38 = vmov 0.0  }
   0xd   : > { %373 = vst.msk [vmem:[#allocation2 + $0x10] sm:$0xff] %vm370_vm0, %v1044_v0  ;;  %s930_s22 = sshll.u32 %s1364_s18, 6  ;;  %962 = vset.pattern.permute.xlu0 %v1045_v37  ;;  %961 = vset.pattern.permute.xlu2 %v1045_v37  ;;  %s1205_s26 = sshll.u32 %s1364_s18, 5 }
   0xe   : > { %371 = vst.msk [vmem:[#allocation2] sm:$0xff] %vm370_vm0, %v1044_v0  ;;  %s343_s25 = scalar_lea.vmem %s1356_s3, %s930_s22  ;;  %963 = vset.pattern.permute.xlu1 %v1045_v37  ;;  %s319_s29 = scalar_lea.vmem %s1353_s0, %s1205_s26 }
   0xf   : > { %372 = vst.msk [vmem:[#allocation2 + $0x8] sm:$0xff] %vm370_vm0, %v1044_v0  ;;  %v393_v1 = vld [vmem:[%s343_s25 + $0x20] sm:$0xff]  ;;  %v394_v2 = vld [vmem:[%s343_s25 + $0x28] sm:$0xff]  ;;  %v395_v8 = vld [vmem:[%s343_s25 + $0x30] sm:$0xff]  ;;  %s1300_s7 = scalar_lea.vmem %s1357_s4, %s1205_s26  ;;  %s1311_s10 = scalar_lea.vmem %s1354_s1, %s1205_s26 }
  0x10   : > { %374 = vst.msk [vmem:[#allocation2 + $0x18] sm:$0xff] %vm370_vm0, %v1044_v0  ;;  %v389_v3 = vld [vmem:[%s343_s25] sm:$0xff]  ;;  %v1105_v4 = vunpack.c.l.bf16 %v393_v1  ;;  %v1107_v5 = vunpack.c.h.bf16 %v393_v1  ;;  %v1109_v6 = vunpack.c.l.bf16 %v394_v2  ;;  %v390_v7 = vld [vmem:[%s343_s25 + $0x8] sm:$0xff]  ;;  %v396_v12 = vld [vmem:[%s343_s25 + $0x38] sm:$0xff]  ;;  %v1117_v14 = vunpack.c.h.bf16 %v394_v2  ;;  %s1318_s13 = scalar_lea.vmem %s1355_s2, %s1205_s26  ;;  %s358_s16 = scalar_lea.vmem %s1358_s5, %s1364_s18 }
  0x11   : > { %v1111_v9 = vunpack.c.l.bf16 %v389_v3  ;;  %v1113_v10 = vunpack.c.h.bf16 %v389_v3  ;;  %v1115_v11 = vunpack.c.l.bf16 %v390_v7  ;;  %v391_v13 = vld [vmem:[%s343_s25 + $0x10] sm:$0xff]  ;;  %v1121_v16 = vunpack.c.l.bf16 %v395_v8  ;;  %v392_v18 = vld [vmem:[%s343_s25 + $0x18] sm:$0xff]  ;;  %375 = vst.msk [vmem:[#allocation3] sm:$0xff] %vm370_vm0, %v1046_v38  ;;  %v563_v55 = vld [vmem:[%s319_s29] sm:$0xff] }
  0x12   : > { %v427_v15 = vmax.f32 %v1105_v4, %v1107_v5  ;;  %v1123_v17 = vunpack.c.h.bf16 %v395_v8  ;;  %v1125_v19 = vunpack.c.h.bf16 %v390_v7  ;;  %v1129_v21 = vunpack.c.l.bf16 %v391_v13  ;;  %376 = vst.msk [vmem:[#allocation3 + $0x8] sm:$0xff] %vm370_vm0, %v1046_v38  ;;  %v564_v56 = vld [vmem:[%s319_s29 + $0x8] sm:$0xff]  ;;  %v565_v57 = vld [vmem:[%s319_s29 + $0x10] sm:$0xff]  ;;  %v566_v58 = vld [vmem:[%s319_s29 + $0x18] sm:$0xff] }
  0x13   : > { %v417_v20 = vmax.f32 %v1111_v9, %v1113_v10  ;;  %v1131_v22 = vunpack.c.h.bf16 %v391_v13  ;;  %v1134_v24 = vunpack.c.l.bf16 %v396_v12  ;;  %v1139_v27 = vunpack.c.l.bf16 %v392_v18  ;;  %377 = vst.msk [vmem:[#allocation3 + $0x10] sm:$0xff] %vm370_vm0, %v1046_v38 }
  0x14   : > { %v428_v23 = vmax.f32 %v427_v15, %v1109_v6  ;;  %v432_v25 = vmax.f32 %v1121_v16, %v1123_v17  ;;  %v1145_v31 = vunpack.c.h.bf16 %v396_v12  ;;  %v1148_v33 = vunpack.c.h.bf16 %v392_v18  ;;  %378 = vst.msk [vmem:[#allocation3 + $0x18] sm:$0xff] %vm370_vm0, %v1046_v38  ;;  %v1169_v39 = vld [vmem:[#allocation2 + $0x10] sm:$0xff] }
  0x15   : > { %v418_v26 = vmax.f32 %v417_v20, %v1115_v11  ;;  %v422_v28 = vmax.f32 %v1129_v21, %v1131_v22  ;;  %379 = vst.msk [vmem:[#allocation4] sm:$0xff] %vm370_vm0, %v1046_v38  ;;  %v1171_v40 = vld [vmem:[#allocation2] sm:$0xff]  ;;  %v384_v7 = vlaneseq }
  0x16   : > { %v429_v29 = vmax.f32 %v428_v23, %v1117_v14  ;;  %v433_v32 = vmax.f32 %v432_v25, %v1134_v24  ;;  %380 = vst.msk [vmem:[#allocation4 + $0x8] sm:$0xff] %vm370_vm0, %v1046_v38  ;;  %v1191_v48 = vld [vmem:[#allocation2 + $0x8] sm:$0xff] }
  0x17   : > { %v419_v30 = vmax.f32 %v418_v26, %v1125_v19  ;;  %v423_v34 = vmax.f32 %v422_v28, %v1139_v27  ;;  %381 = vst.msk [vmem:[#allocation4 + $0x10] sm:$0xff] %vm370_vm0, %v1046_v38  ;;  %v1189_v47 = vld [vmem:[#allocation2 + $0x18] sm:$0xff]  ;;  %v1224_v20 = vand.u32 127, %v384_v7 }
  0x18   : > { %430 = vmax.xlane.f32.xlu1 %v429_v29  ;;  %v434_v35 = vmax.f32 %v433_v32, %v1145_v31  ;;  %382 = vst.msk [vmem:[#allocation4 + $0x18] sm:$0xff] %vm370_vm0, %v1046_v38 }
  0x19   : > { %420 = vmax.xlane.f32.xlu0 %v419_v30  ;;  %v424_v36 = vmax.f32 %v423_v34, %v1148_v33 }
  0x20   : > { %435 = vmax.xlane.f32.xlu1 %v434_v35 }
  0x21   : > { %425 = vmax.xlane.f32.xlu0 %v424_v36  ;;  %v1227_v36 = vadd.s32 128, %v1224_v20 }
  0x8b   : > { %v431_v41 = vpop.xlane.xlu1 %430 }
  0x8c   : > { %v1174_v42 = vmax.f32 %v1169_v39, %v431_v41  ;;  %v421_v43 = vpop.xlane.xlu0 %420 }
  0x8d   : > { %v1177_v44 = vmax.f32 %v1171_v40, %v421_v43 }
  0x8e   : > { %v447_v45 = vsub.f32 %v1169_v39, %v1174_v42  ;;  %560 = vst.msk [vmem:[#allocation2 + $0x10] sm:$0xff] %vm370_vm0, %v1174_v42  ;;  %473 = vperm.xlu0 %962, %v1174_v42   ;;  %v443_v39 = vld [vmem:[#allocation3 + $0x10] sm:$0xff] }
  0x8f   : > { %v445_v46 = vsub.f32 %v1171_v40, %v1177_v44  ;;  %558 = vst.msk [vmem:[#allocation2] sm:$0xff] %vm370_vm0, %v1177_v44  ;;  %463 = vperm.xlu2 %961, %v1177_v44  }
  0x90   : > { %v453_v40 = vmul.f32 1.442695, %v447_v45 }
  0x93   : > { %v436_v49 = vpop.xlane.xlu1 %435 }
  0x94   : > { %v1194_v50 = vmax.f32 %v1189_v47, %v436_v49  ;;  %v426_v51 = vpop.xlane.xlu0 %425 }
  0x95   : > { %v1197_v52 = vmax.f32 %v1191_v48, %v426_v51  ;;  %v1232_v51 = vadd.s32 256, %v1224_v20 }
  0x96   : > { %v448_v53 = vsub.f32 %v1189_v47, %v1194_v50  ;;  %561 = vst.msk [vmem:[#allocation2 + $0x18] sm:$0xff] %vm370_vm0, %v1194_v50  ;;  %478 = vperm.xlu1 %963, %v1194_v50  }
  0x97   : > { %v446_v54 = vsub.f32 %v1191_v48, %v1197_v52  ;;  %559 = vst.msk [vmem:[#allocation2 + $0x8] sm:$0xff] %vm370_vm0, %v1197_v52  ;;  %468 = vperm.xlu2 %961, %v1197_v52   ;;  %v573_v48 = vld [vmem:[#allocation4] sm:$0xff] }
  0x9f   : > { %578 = vperm.xlu2 %961, %v563_v55  }
  0xa7   : > { %581 = vperm.xlu2 %961, %v564_v56  }
  0xaf   : > { %584 = vperm.xlu2 %961, %v565_v57  }
  0xb7   : > { %587 = vperm.xlu2 %961, %v566_v58  }
  0xe9   : > { %v464_v59 = vpop.permute.xlu2 %463 }
  0xea   : > { %v481_v60 = vsub.f32 %v1111_v9, %v464_v59  ;;  %v482_v61 = vsub.f32 %v1113_v10, %v464_v59  ;;  %v483_v62 = vsub.f32 %v1115_v11, %v464_v59  ;;  %v484_v63 = vsub.f32 %v1125_v19, %v464_v59 }
  0xec   : > { %v497_v0 = vmul.f32 1.442695, %v481_v60  ;;  %v499_v1 = vmul.f32 1.442695, %v482_v61  ;;  %v501_v2 = vmul.f32 1.442695, %v483_v62 }
  0xed   : > { %v503_v3 = vmul.f32 1.442695, %v484_v63  ;;  %v1237_v63 = vadd.s32 384, %v1224_v20 }
  0xee   : > { %964 = vpow2.f32 %v497_v0 }
  0xef   : > { %966 = vpow2.f32 %v499_v1 }
  0xf0   : > { %968 = vpow2.f32 %v501_v2 }
  0xf1   : > { %970 = vpow2.f32 %v503_v3  ;;  %v469_v8 = vpop.permute.xlu2 %468 }
  0xf2   : > { %v485_v12 = vsub.f32 %v1129_v21, %v469_v8  ;;  %v486_v13 = vsub.f32 %v1131_v22, %v469_v8  ;;  %v487_v15 = vsub.f32 %v1139_v27, %v469_v8  ;;  %v488_v18 = vsub.f32 %v1148_v33, %v469_v8 }
  0xf4   : > { %v965_v23 = vpop.eup %964  ;;  %v505_v25 = vmul.f32 1.442695, %v485_v12  ;;  %v507_v26 = vmul.f32 1.442695, %v486_v13  ;;  %v509_v28 = vmul.f32 1.442695, %v487_v15 }
  0xf5   : > { %v967_v29 = vpop.eup %966  ;;  %v511_v30 = vmul.f32 1.442695, %v488_v18 }
  0xf6   : > { %v969_v32 = vpop.eup %968  ;;  %972 = vpow2.f32 %v505_v25  ;;  %v529_v34 = vadd.f32 %v967_v29, %v965_v23 }
  0xf7   : > { %v971_v35 = vpop.eup %970  ;;  %974 = vpow2.f32 %v507_v26 }
  0xf8   : > { %976 = vpow2.f32 %v509_v28  ;;  %v530_v37 = vadd.f32 %v969_v32, %v529_v34 }
  0xf9   : > { %978 = vpow2.f32 %v511_v30  ;;  %v579_v41 = vpop.permute.xlu2 %578 }
  0xfa   : > { %v531_v43 = vadd.f32 %v971_v35, %v530_v37  ;;  %vm589_vm1 = vcmp.eq.s32.totalorder %v1224_v20, %v579_v41  ;;  %vm590_vm2 = vcmp.eq.s32.totalorder %v1227_v36, %v579_v41  ;;  %vm591_vm3 = vcmp.eq.s32.totalorder %v1232_v51, %v579_v41 }
  0xfb   : > { %v605_v58 = vsel %vm589_vm1, %v1111_v9, 0.0  ;;  %v606_v59 = vsel %vm590_vm2, %v1113_v10, 0.0  ;;  %v607_v15 = vsel %vm591_vm3, %v1115_v11, 0.0  ;;  %vm592_vm4 = vcmp.eq.s32.totalorder %v1237_v63, %v579_v41 }
  0xfc   : > { %v973_v49 = vpop.eup %972  ;;  %532 = vadd.xlane.f32.xlu1 %v531_v43  ;;  %v621_v7 = vadd.f32 %v606_v59, %v605_v58  ;;  %v608_v26 = vsel %vm592_vm4, %v1125_v19, 0.0 }
  0xfd   : > { %v975_v55 = vpop.eup %974 }
  0xfe   : > { %v977_v56 = vpop.eup %976  ;;  %v534_v57 = vadd.f32 %v975_v55, %v973_v49  ;;  %v622_v18 = vadd.f32 %v621_v7, %v607_v15 }
  0xff   : > { %v979_v60 = vpop.eup %978 }
 0x100   : > { %v474_v61 = vpop.permute.xlu0 %473  ;;  %v535_v62 = vadd.f32 %v977_v56, %v534_v57  ;;  %v623_v34 = vadd.f32 %v622_v18, %v608_v26 }
 0x101   : > { %v489_v0 = vsub.f32 %v1105_v4, %v474_v61  ;;  %v490_v1 = vsub.f32 %v1107_v5, %v474_v61  ;;  %v491_v2 = vsub.f32 %v1109_v6, %v474_v61  ;;  %v1243_v3 = vpop.permute.xlu2 %581  ;;  %v492_v9 = vsub.f32 %v1117_v14, %v474_v61 }
 0x102   : > { %v536_v10 = vadd.f32 %v979_v60, %v535_v62  ;;  %vm593_vm12 = vcmp.eq.s32.totalorder %v1224_v20, %v1243_v3  ;;  %vm594_vm13 = vcmp.eq.s32.totalorder %v1227_v36, %v1243_v3  ;;  %vm595_vm15 = vcmp.eq.s32.totalorder %v1232_v51, %v1243_v3 }
 0x103   : > { %v513_v8 = vmul.f32 1.442695, %v489_v0  ;;  %v515_v12 = vmul.f32 1.442695, %v490_v1  ;;  %v517_v13 = vmul.f32 1.442695, %v491_v2  ;;  %vm596_vm1 = vcmp.eq.s32.totalorder %v1237_v63, %v1243_v3 }
 0x104   : > { %537 = vadd.xlane.f32.xlu2 %v536_v10  ;;  %v519_v23 = vmul.f32 1.442695, %v492_v9  ;;  %v610_v18 = vsel %vm594_vm13, %v1131_v22, 0.0  ;;  %v612_v22 = vsel %vm596_vm1, %v1148_v33, 0.0  ;;  %v442_v3 = vld [vmem:[#allocation3 + $0x8] sm:$0xff] }
 0x105   : > { %980 = vpow2.f32 %v513_v8 }
 0x106   : > { %982 = vpow2.f32 %v515_v12 }
 0x107   : > { %984 = vpow2.f32 %v517_v13 }
 0x108   : > { %v479_v25 = vpop.permute.xlu1 %478  ;;  %986 = vpow2.f32 %v519_v23 }
 0x109   : > { %v493_v28 = vsub.f32 %v1121_v16, %v479_v25  ;;  %v494_v29 = vsub.f32 %v1123_v17, %v479_v25  ;;  %v495_v30 = vsub.f32 %v1134_v24, %v479_v25  ;;  %v585_v32 = vpop.permute.xlu2 %584  ;;  %v496_v11 = vsub.f32 %v1145_v31, %v479_v25 }
 0x10a   : > { %vm597_vm5 = vcmp.eq.s32.totalorder %v1224_v20, %v585_v32  ;;  %vm598_vm6 = vcmp.eq.s32.totalorder %v1227_v36, %v585_v32  ;;  %vm599_vm7 = vcmp.eq.s32.totalorder %v1232_v51, %v585_v32  ;;  %vm600_vm8 = vcmp.eq.s32.totalorder %v1237_v63, %v585_v32 }
 0x10b   : > { %v981_v35 = vpop.eup %980  ;;  %v521_v37 = vmul.f32 1.442695, %v493_v28  ;;  %v523_v41 = vmul.f32 1.442695, %v494_v29  ;;  %v525_v43 = vmul.f32 1.442695, %v495_v30 }
 0x10c   : > { %v983_v19 = vpop.eup %982  ;;  %624 = vadd.xlane.f32.xlu2 %v623_v34  ;;  %v613_v49 = vsel %vm597_vm5, %v1105_v4, 0.0  ;;  %v614_v55 = vsel %vm598_vm6, %v1107_v5, 0.0  ;;  %v527_v59 = vmul.f32 1.442695, %v496_v11  ;;  %v615_v60 = vsel %vm599_vm7, %v1109_v6, 0.0  ;;  %v441_v30 = vld [vmem:[#allocation3] sm:$0xff] }
 0x10d   : > { %988 = vpow2.f32 %v521_v37  ;;  %v539_v56 = vadd.f32 %v983_v19, %v981_v35  ;;  %v631_v57 = vadd.f32 %v614_v55, %v613_v49  ;;  %v985_v58 = vpop.eup %984  ;;  %v616_v1 = vsel %vm600_vm8, %v1117_v14, 0.0  ;;  %v575_v19 = vld [vmem:[#allocation4 + $0x10] sm:$0xff] }
 0x10e   : > { %990 = vpow2.f32 %v523_v41  ;;  %v987_v0 = vpop.eup %986  ;;  %vm365_vm6 = vcmask 0  }
 0x10f   : > { %v540_v61 = vadd.f32 %v985_v58, %v539_v56  ;;  %v632_v62 = vadd.f32 %v631_v57, %v615_v60  ;;  %992 = vpow2.f32 %v525_v43  ;;  %v656_v56 = vld [vmem:[#allocation2] sm:$0xff]  ;;  %v576_v60 = vld [vmem:[#allocation4 + $0x18] sm:$0xff]  ;;  %366 = vst.msk [vmem:[%s358_s16] sm:$0x1] %vm365_vm6, %v1046_v38 }
 0x110   : > { %994 = vpow2.f32 %v527_v59 }
 0x111   : > { %v588_v2 = vpop.permute.xlu2 %587  ;;  %v541_v4 = vadd.f32 %v987_v0, %v540_v61  ;;  %v633_v7 = vadd.f32 %v632_v62, %v616_v1 }
 0x112   : > { %vm601_vm9 = vcmp.eq.s32.totalorder %v1224_v20, %v588_v2  ;;  %vm602_vm10 = vcmp.eq.s32.totalorder %v1227_v36, %v588_v2  ;;  %vm603_vm11 = vcmp.eq.s32.totalorder %v1232_v51, %v588_v2  ;;  %vm604_vm14 = vcmp.eq.s32.totalorder %v1237_v63, %v588_v2 }
 0x113   : > { %v989_v5 = vpop.eup %988  ;;  %542 = vadd.xlane.f32.xlu0 %v541_v4  ;;  %v617_v6 = vsel %vm601_vm9, %v1121_v16, 0.0  ;;  %v618_v14 = vsel %vm602_vm10, %v1123_v17, 0.0  ;;  %v619_v12 = vsel %vm603_vm11, %v1134_v24, 0.0  ;;  %v609_v20 = vsel %vm593_vm12, %v1129_v21, 0.0 }
 0x114   : > { %v991_v9 = vpop.eup %990  ;;  %634 = vadd.xlane.f32.xlu2 %v633_v7  ;;  %v636_v10 = vadd.f32 %v618_v14, %v617_v6  ;;  %v620_v23 = vsel %vm604_vm14, %v1145_v31, 0.0  ;;  %v626_v26 = vadd.f32 %v610_v18, %v609_v20  ;;  %v611_v24 = vsel %vm595_vm15, %v1139_v27, 0.0  ;;  %v694_v6 = vld [vmem:[%s1311_s10] sm:$0xff]  ;;  %v658_v18 = vld [vmem:[#allocation2 + $0x10] sm:$0xff] }
 0x115   : > { %v544_v8 = vadd.f32 %v991_v9, %v989_v5  ;;  %v993_v13 = vpop.eup %992  ;;  %v449_v31 = vmul.f32 1.442695, %v445_v46  ;;  %v451_v51 = vmul.f32 1.442695, %v446_v54  ;;  %v455_v54 = vmul.f32 1.442695, %v448_v53 }
 0x116   : > { %v637_v15 = vadd.f32 %v636_v10, %v619_v12  ;;  %v995_v16 = vpop.eup %994  ;;  %v627_v21 = vadd.f32 %v626_v26, %v611_v24  ;;  %v444_v53 = vld [vmem:[#allocation3 + $0x18] sm:$0xff]  ;;  %v574_v5 = vld [vmem:[#allocation4 + $0x8] sm:$0xff]  ;;  %v685_v14 = vld [vmem:[%s1318_s13] sm:$0xff] }
 0x117   : > { %v545_v36 = vadd.f32 %v993_v13, %v544_v8  ;;  %996 = vpow2.f32 %v449_v31  ;;  %vm689_vm2 = vcmp.gt.f32.partialorder %v685_v14, 0.5 }
 0x118   : > { %v638_v25 = vadd.f32 %v637_v15, %v620_v23  ;;  %v628_v28 = vadd.f32 %v627_v21, %v612_v22  ;;  %998 = vpow2.f32 %v451_v51  ;;  %v687_v23 = vld [vmem:[%s1318_s13 + $0x10] sm:$0xff]  ;;  %v657_v21 = vld [vmem:[#allocation2 + $0x8] sm:$0xff] }
 0x119   : > { %v546_v17 = vadd.f32 %v995_v16, %v545_v36  ;;  %vm691_vm3 = vcmp.gt.f32.partialorder %v687_v23, 0.5 }
 0x11b   : > { %547 = vadd.xlane.f32.xlu1 %v546_v17  ;;  %639 = vadd.xlane.f32.xlu0 %v638_v25  ;;  %v696_v17 = vld [vmem:[%s1311_s10 + $0x10] sm:$0xff] }
 0x11d   : > { %v997_v29 = vpop.eup %996 }
 0x11e   : > { %v457_v27 = vmul.f32 %v997_v29, %v441_v30  ;;  %v999_v33 = vpop.eup %998  ;;  %v686_v29 = vld [vmem:[%s1318_s13 + $0x8] sm:$0xff] }
 0x11f   : > { %v458_v34 = vmul.f32 %v999_v33, %v442_v3  ;;  %v659_v33 = vld [vmem:[#allocation2 + $0x18] sm:$0xff]  ;;  %vm690_vm4 = vcmp.gt.f32.partialorder %v686_v29, 0.5 }
 0x123   : > { %629 = vadd.xlane.f32.xlu1 %v628_v28 }
 0x16f   : > { %v533_v32 = vpop.xlane.xlu1 %532 }
 0x170   : > { %v549_v63 = vadd.f32 %v533_v32, %v457_v27  ;;  %v695_v32 = vld [vmem:[%s1311_s10 + $0x8] sm:$0xff] }
 0x172   : > { %554 = vst.msk [vmem:[#allocation3] sm:$0xff] %vm370_vm0, %v549_v63 }
 0x177   : > { %v538_v11 = vpop.xlane.xlu2 %537 }
 0x178   : > { %v550_v44 = vadd.f32 %v538_v11, %v458_v34 }
 0x179   : > { %v660_v46 = vld [vmem:[#allocation3] sm:$0xff] }
 0x17a   : > { %555 = vst.msk [vmem:[#allocation3 + $0x8] sm:$0xff] %vm370_vm0, %v550_v44  ;;  %1000 = vlog2.f32 %v660_v46  ;;  %v697_v46 = vld [vmem:[%s1311_s10 + $0x18] sm:$0xff] }
 0x17b   : > { %1002 = vpow2.f32 %v453_v40  ;;  %v688_v40 = vld [vmem:[%s1318_s13 + $0x18] sm:$0xff] }
 0x17c   : > { %1004 = vpow2.f32 %v455_v54  ;;  %vm692_vm5 = vcmp.gt.f32.partialorder %v688_v40, 0.5 }
 0x17f   : > { %v625_v52 = vpop.xlane.xlu2 %624 }
 0x180   : > { %v641_v35 = vadd.f32 %v625_v52, %v573_v48  ;;  %v1001_v37 = vpop.eup %1000 }
 0x181   : > { %v1003_v41 = vpop.eup %1002  ;;  %v665_v42 = vmul.f32 0.6931472, %v1001_v37  ;;  %v661_v4 = vld [vmem:[#allocation3 + $0x8] sm:$0xff] }
 0x182   : > { %645 = vst.msk [vmem:[#allocation4] sm:$0xff] %vm370_vm0, %v641_v35  ;;  %v459_v45 = vmul.f32 %v1003_v41, %v443_v39  ;;  %v1005_v50 = vpop.eup %1004 }
 0x183   : > { %v672_v58 = vadd.f32 %v665_v42, %v656_v56  ;;  %v460_v61 = vmul.f32 %v1005_v50, %v444_v53 }
 0x186   : > { %v543_v43 = vpop.xlane.xlu0 %542 }
 0x187   : > { %v551_v49 = vadd.f32 %v543_v43, %v459_v45  ;;  %v635_v55 = vpop.xlane.xlu2 %634 }
 0x188   : > { %v643_v57 = vadd.f32 %v635_v55, %v575_v19 }
 0x189   : > { %556 = vst.msk [vmem:[#allocation3 + $0x10] sm:$0xff] %vm370_vm0, %v551_v49  ;;  %v652_v47 = vld [vmem:[#allocation4] sm:$0xff] }
 0x18a   : > { %647 = vst.msk [vmem:[#allocation4 + $0x10] sm:$0xff] %vm370_vm0, %v643_v57  ;;  %v676_v59 = vsub.f32 %v652_v47, %v672_v58 }
 0x18c   : > { %680 = vst.msk [vmem:[%s1300_s7] sm:$0xff] %vm370_vm0, %v676_v59  ;;  %v698_v12 = vsub.f32 %v694_v6, %v676_v59 }
 0x18e   : > { %v548_v62 = vpop.xlane.xlu1 %547  ;;  %v640_v0 = vpop.xlane.xlu0 %639  ;;  %v702_v26 = vsel %vm689_vm2, %v698_v12, 0.0 }
 0x18f   : > { %v552_v1 = vadd.f32 %v548_v62, %v460_v61  ;;  %v644_v2 = vadd.f32 %v640_v0, %v576_v60  ;;  %v706_v28 = vmul.f32 1.442695, %v702_v26 }
 0x190   : > { %v662_v7 = vld [vmem:[#allocation3 + $0x10] sm:$0xff] }
 0x191   : > { %557 = vst.msk [vmem:[#allocation3 + $0x18] sm:$0xff] %vm370_vm0, %v552_v1  ;;  %1006 = vlog2.f32 %v662_v7  ;;  %v654_v16 = vld [vmem:[#allocation4 + $0x10] sm:$0xff] }
 0x192   : > { %648 = vst.msk [vmem:[#allocation4 + $0x18] sm:$0xff] %vm370_vm0, %v644_v2  ;;  %1008 = vlog2.f32 %v661_v4 }
 0x196   : > { %v630_v9 = vpop.xlane.xlu1 %629 }
 0x197   : > { %v1007_v10 = vpop.eup %1006  ;;  %v642_v8 = vadd.f32 %v630_v9, %v574_v5 }
 0x198   : > { %v1009_v13 = vpop.eup %1008  ;;  %v663_v15 = vld [vmem:[#allocation3 + $0x18] sm:$0xff]  ;;  %v669_v20 = vmul.f32 0.6931472, %v1007_v10 }
 0x199   : > { %646 = vst.msk [vmem:[#allocation4 + $0x8] sm:$0xff] %vm370_vm0, %v642_v8  ;;  %1010 = vlog2.f32 %v663_v15  ;;  %v667_v25 = vmul.f32 0.6931472, %v1009_v13  ;;  %v655_v44 = vld [vmem:[#allocation4 + $0x18] sm:$0xff]  ;;  %v722_v8 = vld [vmem:[%s358_s16] sm:$0x1] }
 0x19a   : > { %v674_v36 = vadd.f32 %v669_v20, %v658_v18  ;;  %1012 = vpow2.f32 %v706_v28 }
 0x19b   : > { %v673_v51 = vadd.f32 %v667_v25, %v657_v21 }
 0x19c   : > { %v678_v24 = vsub.f32 %v654_v16, %v674_v36 }
 0x19e   : > { %v700_v22 = vsub.f32 %v696_v17, %v678_v24  ;;  %682 = vst.msk [vmem:[%s1300_s7 + $0x10] sm:$0xff] %vm370_vm0, %v678_v24 }
 0x19f   : > { %v1011_v31 = vpop.eup %1010 }
 0x1a0   : > { %v653_v30 = vld [vmem:[#allocation4 + $0x8] sm:$0xff]  ;;  %v671_v27 = vmul.f32 0.6931472, %v1011_v31  ;;  %v704_v63 = vsel %vm691_vm3, %v700_v22, 0.0  ;;  %v1013_v41 = vpop.eup %1012 }
 0x1a1   : > { %v677_v3 = vsub.f32 %v653_v30, %v673_v51  ;;  %v710_v34 = vmul.f32 1.442695, %v704_v63  ;;  %v714_v19 = vsub.f32 %v1013_v41, %v702_v26 }
 0x1a2   : > { %v675_v11 = vadd.f32 %v671_v27, %v659_v33 }
 0x1a3   : > { %681 = vst.msk [vmem:[%s1300_s7 + $0x8] sm:$0xff] %vm370_vm0, %v677_v3  ;;  %v699_v48 = vsub.f32 %v695_v32, %v677_v3  ;;  %1014 = vpow2.f32 %v710_v34  ;;  %v921_v56 = vadd.f32 -1.0, %v714_v19 }
 0x1a4   : > { %v679_v52 = vsub.f32 %v655_v44, %v675_v11 }
 0x1a5   : > { %v703_v54 = vsel %vm690_vm4, %v699_v48, 0.0  ;;  %v723_v53 = vsel %vm370_vm0, %v921_v56, 0.0 }
 0x1a6   : > { %683 = vst.msk [vmem:[%s1300_s7 + $0x18] sm:$0xff] %vm370_vm0, %v679_v52  ;;  %v701_v35 = vsub.f32 %v697_v46, %v679_v52  ;;  %v708_v37 = vmul.f32 1.442695, %v703_v54 }
 0x1a8   : > { %v705_v39 = vsel %vm692_vm5, %v701_v35, 0.0  ;;  %1016 = vpow2.f32 %v708_v37 }
 0x1a9   : > { %v712_v42 = vmul.f32 1.442695, %v705_v39  ;;  %v1015_v45 = vpop.eup %1014 }
 0x1aa   : > { %v716_v43 = vsub.f32 %v1015_v45, %v704_v63 }
 0x1ab   : > { %1018 = vpow2.f32 %v712_v42 }
 0x1ac   : > { %v923_v47 = vadd.f32 -1.0, %v716_v43 }
 0x1ae   : > { %v1017_v49 = vpop.eup %1016  ;;  %v726_v62 = vsel %vm370_vm0, %v923_v47, 0.0 }
 0x1af   : > { %v715_v55 = vsub.f32 %v1017_v49, %v703_v54 }
 0x1b1   : > { %v1019_v57 = vpop.eup %1018  ;;  %v922_v58 = vadd.f32 -1.0, %v715_v55 }
 0x1b2   : > { %v717_v50 = vsub.f32 %v1019_v57, %v705_v39 }
 0x1b3   : > { %v724_v59 = vsel %vm370_vm0, %v922_v58, 0.0 }
 0x1b4   : > { %v924_v60 = vadd.f32 -1.0, %v717_v50  ;;  %v725_v61 = vadd.f32 %v724_v59, %v723_v53 }
 0x1b6   : > { %v727_v0 = vadd.f32 %v726_v62, %v725_v61  ;;  %v728_v1 = vsel %vm370_vm0, %v924_v60, 0.0 }
 0x1b8   : > { %v729_v2 = vadd.f32 %v728_v1, %v727_v0 }
 0x1ba   : > { %730 = vadd.xlane.f32.xlu1 %v729_v2 }
 0x22d   : > { %v731_v4 = vpop.xlane.xlu1 %730 }
 0x22e   : > { %v732_v7 = vrot.slane %v731_v4, 4 }
 0x230   : > { %v733_v5 = vadd.f32 %v732_v7, %v731_v4 }
 0x232   : > { %v734_v6 = vrot.slane %v733_v5, 2 }
 0x234   : > { %v735_v14 = vadd.f32 %v734_v6, %v733_v5 }
 0x236   : > { %v736_v9 = vrot.slane %v735_v14, 1 }
 0x238   : > { %v737_v10 = vadd.f32 %v736_v9, %v735_v14 }
 0x23a   : > { %932 = vpush %v737_v10 }
 0x26b   : > { %s933_s17 = spop %932 }
 0x26c   : > { %v739_v12 = vstv %s933_s17 }
 0x26d   : > { %v740_v13 = vadd.f32 %v739_v12, %v722_v8 }
 0x26f   : > { %742 = vst.msk [vmem:[%s358_s16] sm:$0x1] %vm365_vm6, %v740_v13 }
 0x270 PF: > { %s16_s20 = sadd.s32 1, %s1042_s20   ;;  %s1359_s18 = smov %s1038_s19 }
 0x271   : > { %p13_p5 = scmp.ge.s32.totalorder %s16_s20, 4   ;;  %s1360_s19 = smov %s1362_s21 }
 0x273   :  { %15 = sbr.rel (!%p13_p5) target bundleno = 2 (0x2), region = 102 }

</bundles_post_ra>
